<compile_context>
chip_gen: v7x
topology: tpu7x:2x2x1
jax: 0.10.0
libtpu: 0.0.40
codegen_flags: <defaults>
</compile_context>

<pallas_src>
import functools

import jax
import jax.numpy as jnp
from jax.experimental import pallas as pl
from jax.experimental.pallas import tpu as pltpu


def _ica_project_kernel(x_ref, wt_ref, bias_ref, o_ref, *, compute_dtype):
    # x_ref:    (tm, C)  native dtype; cast (if any) happens here, on the VPU,
    #                    hidden under the DMA pipeline.
    # wt_ref:   (C, K)   compute dtype, resident across the grid.
    # bias_ref: (1, K)   f32, resident (bias = mean @ W_c.T).
    # o_ref:    (tm, K)  f32, narrow output (masked vst; minimal HBM bytes).
    x = x_ref[...].astype(compute_dtype)
    acc = jnp.dot(x, wt_ref[...], preferred_element_type=jnp.float32)
    o_ref[...] = (acc - bias_ref[...]).astype(o_ref.dtype)


def _round_up(x, m):
    return (x + m - 1) // m * m


def _pick_tm(T, *, tm_max=2048, min_steps=8, granule=256):
    """Row tile: as large as possible (amortize per-step overhead) while still
    leaving ~min_steps grid steps when T permits (v7x: >=4 steps per core)."""
    tm = _round_up(pl.cdiv(T, min_steps), granule)   # >= min_steps steps
    tm = min(tm, tm_max)                             # cap per-step DMA size
    tm = min(tm, _round_up(T, 16))                   # don't exceed T (rounded)
    return max(tm, 16)


def ica_transform(x, mean, components, *, tm=None, compute_dtype=jnp.float32):
    """(x - mean) @ components.T via Pallas.

    x: [T, C], mean: [C] f32, components: [K, C] f32  ->  [T, K] f32.
    Arbitrary T supported (ragged trailing row block handled by Pallas).
    """
    T, C = x.shape
    K, C2 = components.shape
    assert C2 == C
    if tm is None:
        tm = _pick_tm(T)
    assert tm % 16 == 0

    # Resident projection matrix in compute precision.
    w_c = components.T.astype(compute_dtype)                       # [C, K]

    # Fold the mean subtraction into a bias computed from the SAME W the MXU
    # sees (exact f32 VPU reduction, no matmul-precision ambiguity):
    #   (x_c - mean) @ W_c == x_c @ W_c - mean @ W_c
    bias = jnp.sum(
        mean.astype(jnp.float32)[:, None] * w_c.astype(jnp.float32), axis=0
    ).reshape(1, K)                                                # [1, K] f32

    num_tiles = pl.cdiv(T, tm)
    x_bytes = jnp.dtype(x.dtype).itemsize
    w_bytes = jnp.dtype(compute_dtype).itemsize

    out = pl.pallas_call(
        functools.partial(_ica_project_kernel, compute_dtype=compute_dtype),
        out_shape=jax.ShapeDtypeStruct((T, K), jnp.float32),
        grid_spec=pltpu.PrefetchScalarGridSpec(
            num_scalar_prefetch=0,
            grid=(num_tiles,),
            in_specs=[
                pl.BlockSpec((tm, C), lambda i: (i, 0)),   # x tile over time
                pl.BlockSpec((C, K), lambda i: (0, 0)),    # W.T (resident)
                pl.BlockSpec((1, K), lambda i: (0, 0)),    # folded bias
            ],
            out_specs=pl.BlockSpec((tm, K), lambda i: (i, 0)),
        ),
        compiler_params=pltpu.CompilerParams(
            dimension_semantics=("parallel",),             # shard time on v7x
        ),
        cost_estimate=pl.CostEstimate(
            flops=2 * T * C * K,
            transcendentals=0,
            bytes_accessed=T * C * x_bytes + C * K * w_bytes + K * 4 + T * K * 4,
        ),
    )(x, w_c, bias)

    return out


def ica_transform_ref(x, mean, components):
    # Exact f32 reference built on the VPU (broadcast-multiply + sum) so it is
    # independent of any TPU matmul precision policy.
    return jnp.sum(
        (x - mean[None, :])[:, None, :] * components[None, :, :], axis=-1
    )


if __name__ == "__main__":
    key = jax.random.PRNGKey(0)
    k_x, k_m, k_w = jax.random.split(key, 3)

    # A small batch of concatenated EEG windows: [T, C] -> [T, n_components].
    # T is deliberately NOT a multiple of the row tile, so the ragged trailing
    # block (masked reads / masked writeback) path is exercised.
    T, C, n_components = 1000, 32, 20

    x = jax.random.normal(k_x, (T, C), dtype=jnp.float32)
    # Deterministic synthetic ICA parameters (would normally come from .fit()).
    mean = jax.random.normal(k_m, (C,), dtype=jnp.float32) * 0.1
    components = jax.random.normal(k_w, (n_components, C), dtype=jnp.float32)

    ref = ica_transform_ref(x, mean, components)

    # (1) Default float32 path: full-fidelity MXU inputs, f32 accumulation.
    out = ica_transform(x, mean, components)
    out = jax.block_until_ready(out)
    assert out.shape == (T, n_components)
    assert out.dtype == jnp.float32
    assert jnp.allclose(out, ref, atol=5e-2, rtol=5e-2)

    # (2) Optional bf16-MXU-input path (for data already stored in bf16).
    out_bf = ica_transform(x, mean, components, compute_dtype=jnp.bfloat16)
    out_bf = jax.block_until_ready(out_bf)
    # Tight check against a reference built from the SAME bf16-quantized
    # operands (isolates tiling / bias-fold / masking from quantization):
    xq = x.astype(jnp.bfloat16).astype(jnp.float32)
    wq = components.astype(jnp.bfloat16).astype(jnp.float32)
    ref_q = jnp.sum((xq - mean[None, :])[:, None, :] * wq[None, :, :], axis=-1)
    assert jnp.allclose(out_bf, ref_q, atol=5e-3, rtol=5e-3)
    # Loose sanity check against the exact f32 reference (bf16 budget).
    assert jnp.allclose(out_bf, ref, atol=2e-1, rtol=5e-2)

    print("KERNEL_OK")
</pallas_src>

<mosaic_0001>
module attributes {stable_mosaic.version = 11 : i64} {
  func.func @_ica_project_kernel(%arg0: i32, %arg1: memref<256x32xf32, #tpu.memory_space<vmem>>, %arg2: memref<32x20xf32, #tpu.memory_space<vmem>>, %arg3: memref<1x20xf32, #tpu.memory_space<vmem>>, %arg4: memref<256x20xf32, #tpu.memory_space<vmem>>) attributes {dimension_semantics = [#tpu.dimension_semantics<parallel>], iteration_bounds = array<i64: 4>, scalar_prefetch = 0 : i64, scratch_operands = 0 : i64, tpu.core_type = #tpu.core_type<tc>, window_params = [{transform_indices = @transform_0, window_bounds = array<i64: 256, 32>}, {pipeline_mode = #tpu.pipeline_mode<synchronous>, transform_indices = @transform_1, window_bounds = array<i64: 32, 20>}, {pipeline_mode = #tpu.pipeline_mode<synchronous>, transform_indices = @transform_2, window_bounds = array<i64: 1, 20>}, {transform_indices = @transform_3, window_bounds = array<i64: 256, 20>}]} {
    %c0 = arith.constant 0 : index
    %c0_0 = arith.constant 0 : index
    %0 = vector.load %arg1[%c0, %c0_0] : memref<256x32xf32, #tpu.memory_space<vmem>>, vector<256x32xf32>
    %c0_1 = arith.constant 0 : index
    %c0_2 = arith.constant 0 : index
    %1 = vector.load %arg2[%c0_1, %c0_2] : memref<32x20xf32, #tpu.memory_space<vmem>>, vector<32x20xf32>
    %cst = arith.constant dense<0.000000e+00> : vector<256x20xf32>
    %2 = tpu.matmul %0, %1, %cst {dimension_numbers = #tpu.dot_dimension_numbers<[1], [0], [0], [1], [0, 0, 1, 1], [], []>} : vector<256x32xf32>, vector<32x20xf32>, vector<256x20xf32> -> vector<256x20xf32>
    %c0_3 = arith.constant 0 : index
    %c0_4 = arith.constant 0 : index
    %3 = vector.load %arg3[%c0_3, %c0_4] : memref<1x20xf32, #tpu.memory_space<vmem>>, vector<1x20xf32>
    %4 = vector.broadcast %3 : vector<1x20xf32> to vector<256x20xf32>
    %5 = arith.subf %2, %4 : vector<256x20xf32>
    %c0_5 = arith.constant 0 : index
    %c0_6 = arith.constant 0 : index
    %6 = vector.load %arg4[%c0_5, %c0_6] : memref<256x20xf32, #tpu.memory_space<vmem>>, vector<256x20xf32>
    tpu.vector_store %arg4[%c0_5, %c0_6], %5 {strides = array<i32>} : memref<256x20xf32, #tpu.memory_space<vmem>>, vector<256x20xf32>,
    return
  }
  func.func @transform_0(%arg0: i32) -> (i32, i32) {
    %c0_i32 = arith.constant 0 : i32
    %c0_i32_0 = arith.constant 0 : i32
    return %arg0, %c0_i32 : i32, i32
  }
  func.func @transform_1(%arg0: i32) -> (i32, i32) {
    %c0_i32 = arith.constant 0 : i32
    %c0_i32_0 = arith.constant 0 : i32
    %c0_i32_1 = arith.constant 0 : i32
    return %c0_i32, %c0_i32_0 : i32, i32
  }
  func.func @transform_2(%arg0: i32) -> (i32, i32) {
    %c0_i32 = arith.constant 0 : i32
    %c0_i32_0 = arith.constant 0 : i32
    %c0_i32_1 = arith.constant 0 : i32
    return %c0_i32, %c0_i32_0 : i32, i32
  }
  func.func @transform_3(%arg0: i32) -> (i32, i32) {
    %c0_i32 = arith.constant 0 : i32
    %c0_i32_0 = arith.constant 0 : i32
    return %arg0, %c0_i32 : i32, i32
  }
}

</mosaic_0001>

<bundles_post_ra>
// kernel: tpu_custom_call.1
= control target key start
LH: loop header
LB: loop body
LE: loop exit
PB: predicated region body
PF: predicated region fallthrough
CT: control target
= control target key end

     0   :  { %s1321_s12 = smov 0   ;;  %s1323_s13 = smov 0   ;;  %s1679_s0 = inlined_call_operand.vmem [shape: f32[1000,32], index: 0, kind: input, shape index: {}]   ;;  %s1680_s1 = inlined_call_operand.vmem [shape: f32[32,20], index: 1, kind: input, shape index: {}]   ;;  %s1681_s2 = inlined_call_operand.vmem [shape: f32[1,20], index: 2, kind: input, shape index: {}]   ;;  %s1682_s3 = inlined_call_operand.vmem [shape: f32[1000,20], index: 3, kind: output, shape index: {}]  }
   0x1   :  { %s1325_s14 = smov 0  }
   0x2 LB: > { %s1334_s15 = sadd.s32 4294967295, %s1267_s14   ;;  %s1336_s16 = sadd.s32 1, %s1267_s14   ;;  %s1267_s14 = sphi %s1325_s14, %s1691_s14   ;;  %s1263_s13 = sphi %s1323_s13, %s1690_s13   ;;  %s1259_s12 = sphi %s1321_s12, %s1689_s12  }
   0x3   : > { %s85_s17 = ssub.s32 %s1267_s14, %s1336_s16  ;;  %s88_s18 = sadd.s32 1, %s1263_s13 }
   0x4   : > { %p86_p0 = scmp.eq.s32.totalorder %s85_s17, 0  ;;  %p98_p1 = scmp.ne.s32.totalorder %s1263_s13, %s1259_s12 }
   0x5   : > { %p99_p2 = scmp.eq.s32.totalorder %s1334_s15, 3  ;;  %p964_p3 = scmp.ge.s32.totalorder %s1267_s14, 1 }
   0x6   : > { %s1344_s19 = scalar_select %p86_p0, %s1263_s13, %s88_s18  }
   0x7   : > { %p1346_p4 = por %p99_p2, %p98_p1  ;;  %p146_p5 = scmp.lt.s32.totalorder %s1267_s14, 5 }
   0x9   : > { %p147_p6 = pnand %p964_p3, %p146_p5 }
   0xa   : > { %v224_v0 = vld [vmem:[%s1680_s1] sm:$0xff] (!%p147_p6)  ;;  %v225_v1 = vld [vmem:[%s1680_s1 + $0x8] sm:$0xff] (!%p147_p6)  ;;  %v226_v2 = vld [vmem:[%s1680_s1 + $0x10] sm:$0xff] (!%p147_p6)  ;;  %s1360_s27 = sshll.u32 (!%p147_p6), %s1334_s15, 5  ;;  %vm228_vm0 = vcmask (!%p147_p6), 261120   ;;  %s170_s8 = sand.u32 (!%p147_p6), 1, %s1259_s12  }
   0xb   : > { %150 = sbr.rel (%p147_p6) target bundleno = 325 (0x145), region = 32  ;;  %v1113_v3 = vpack.c.bf16 (!%p147_p6), %v225_v1, %v224_v0  ;;  %v227_v4 = vld [vmem:[%s1680_s1 + $0x18] sm:$0xff] (!%p147_p6)  ;;  %p178_p7 = scmp.lt.s32.totalorder (!%p147_p6), %s1360_s27, 124  ;;  %v1440_v38 = vld [vmem:[%s1681_s2] ss:$0 sm:$0xff] (!%p147_p6)  ;;  %vm589_vm1 = vcmask (!%p147_p6), 162816  }
   0xc   : > { %v1117_v5 = vpack.c.bf16 (!%p147_p6), %v227_v4, %v226_v2  ;;  %s965_s9 = sshll.u32 (!%p147_p6), %s170_s8, 8 }
   0xd   : > { %1114 = vmatprep.subr.bf16.mxu0 (!%p147_p6), %v1113_v3  ;;  %1121 = vmatprep.subr.bf16.mxu1 (!%p147_p6), %v1113_v3  ;;  %s1446_s12 = scalar_lea.vmem (!%p147_p6), [#allocation2], %s965_s9  }
   0xe   : > { %1116 = vmatpush3.bf16.msra.mxu0 (!%p147_p6), %v1113_v3  ;;  %1123 = vmatpush3.bf16.msra.mxu1 (!%p147_p6), %v1113_v3 }
   0xf   : > { %1118 = vmatprep.subr.bf16.mxu0 (!%p147_p6), %v1117_v5  ;;  %1122 = vmatprep.subr.bf16.mxu1 (!%p147_p6), %v1117_v5 }
  0x12   : > { %s179_s30 = scalar_select %p178_p7, %s1360_s27, 124  ;;  %1120 = vmatpush3.bf16.msra.mxu0 %v1117_v5  ;;  %1124 = vmatpush3.bf16.msra.mxu1 %v1117_v5 }
  0x13   : > { %s630_s14 = ssub.s32 (%p1346_p4), 125, %s1360_s27  ;;  %s1018_s17 = sshll.u32 (%p1346_p4), %s1334_s15, 8 }
  0x14   : > { %s967_s4 = sshll.u32 %s179_s30, 3  ;;  %p631_p8 = scmp.lt.s32.totalorder (%p1346_p4), %s630_s14, 32 }
  0x15   : > { %s1370_s7 = scalar_lea.vmem %s1679_s0, %s967_s4  ;;  %s1547_s22 = scalar_lea.vmem (%p1346_p4), %s1682_s3, %s1018_s17  }
  0x16   : > { %v192_v6 = vld [vmem:[%s1370_s7] sm:$0xff]  ;;  %v193_v8 = vld [vmem:[%s1370_s7 + $0x8] sm:$0xff]  ;;  %v194_v10 = vld [vmem:[%s1370_s7 + $0x10] sm:$0xff] }
  0x17   : > { %v208_v7 = vld [vmem:[%s1370_s7 + $0x80] sm:$0xff]  ;;  %v209_v9 = vld [vmem:[%s1370_s7 + $0x88] sm:$0xff]  ;;  %1065 = vmatprep.mubr.msk.f32.mxu0 %vm228_vm0, %v192_v6  ;;  %v210_v11 = vld [vmem:[%s1370_s7 + $0x90] sm:$0xff] }
  0x18   : > { %1089 = vmatprep.mubr.msk.f32.mxu1 %vm228_vm0, %v208_v7  ;;  %1066 = vmatmul.mubr.msk.f32.vlgmr.msra.gmra.mrb[0].mxu0 %vm228_vm0, %v193_v8  ;;  %v195_v12 = vld [vmem:[%s1370_s7 + $0x18] sm:$0xff]  ;;  %v196_v14 = vld [vmem:[%s1370_s7 + $0x20] sm:$0xff]  ;;  %v197_v16 = vld [vmem:[%s1370_s7 + $0x28] sm:$0xff] }
  0x19   : > { %1090 = vmatmul.mubr.msk.f32.vlgmr.msra.gmra.mrb[0].mxu1 %vm228_vm0, %v209_v9  ;;  %1068 = vmatprep.mubr.msk.f32.mxu0 %vm228_vm0, %v194_v10  ;;  %v211_v13 = vld [vmem:[%s1370_s7 + $0x98] sm:$0xff]  ;;  %v212_v15 = vld [vmem:[%s1370_s7 + $0xa0] sm:$0xff]  ;;  %v213_v17 = vld [vmem:[%s1370_s7 + $0xa8] sm:$0xff] }
  0x1a   : > { %1092 = vmatprep.mubr.msk.f32.mxu1 %vm228_vm0, %v210_v11  ;;  %v198_v18 = vld [vmem:[%s1370_s7 + $0x30] sm:$0xff]  ;;  %v199_v20 = vld [vmem:[%s1370_s7 + $0x38] sm:$0xff]  ;;  %v200_v22 = vld [vmem:[%s1370_s7 + $0x40] sm:$0xff] }
  0x1b   : > { %v214_v19 = vld [vmem:[%s1370_s7 + $0xb0] sm:$0xff]  ;;  %v215_v21 = vld [vmem:[%s1370_s7 + $0xb8] sm:$0xff]  ;;  %v216_v23 = vld [vmem:[%s1370_s7 + $0xc0] sm:$0xff] }
  0x1c   : > { %1069 = vmatmul.mubr.msk.f32.gmra.mrb[2].mxu0 %vm228_vm0, %v195_v12  ;;  %v201_v24 = vld [vmem:[%s1370_s7 + $0x48] sm:$0xff]  ;;  %v202_v26 = vld [vmem:[%s1370_s7 + $0x50] sm:$0xff]  ;;  %v203_v28 = vld [vmem:[%s1370_s7 + $0x58] sm:$0xff] }
  0x1d   : > { %1093 = vmatmul.mubr.msk.f32.gmra.mrb[2].mxu1 %vm228_vm0, %v211_v13  ;;  %1071 = vmatprep.mubr.msk.f32.mxu0 %vm228_vm0, %v196_v14  ;;  %v217_v25 = vld [vmem:[%s1370_s7 + $0xc8] sm:$0xff]  ;;  %v218_v27 = vld [vmem:[%s1370_s7 + $0xd0] sm:$0xff]  ;;  %v219_v29 = vld [vmem:[%s1370_s7 + $0xd8] sm:$0xff] }
  0x1e   : > { %1095 = vmatprep.mubr.msk.f32.mxu1 %vm228_vm0, %v212_v15  ;;  %v204_v30 = vld [vmem:[%s1370_s7 + $0x60] sm:$0xff]  ;;  %v205_v32 = vld [vmem:[%s1370_s7 + $0x68] sm:$0xff]  ;;  %v206_v34 = vld [vmem:[%s1370_s7 + $0x70] sm:$0xff] }
  0x1f   : > { %v220_v31 = vld [vmem:[%s1370_s7 + $0xe0] sm:$0xff]  ;;  %v221_v33 = vld [vmem:[%s1370_s7 + $0xe8] sm:$0xff]  ;;  %v222_v35 = vld [vmem:[%s1370_s7 + $0xf0] sm:$0xff] }
  0x20   : > { %1072 = vmatmul.mubr.msk.f32.gmra.mrb[4].mxu0 %vm228_vm0, %v197_v16  ;;  %v207_v36 = vld [vmem:[%s1370_s7 + $0x78] sm:$0xff] }
  0x21   : > { %1096 = vmatmul.mubr.msk.f32.gmra.mrb[4].mxu1 %vm228_vm0, %v213_v17  ;;  %1074 = vmatprep.mubr.msk.f32.mxu0 %vm228_vm0, %v198_v18  ;;  %v223_v37 = vld [vmem:[%s1370_s7 + $0xf8] sm:$0xff] }
  0x22   : > { %1098 = vmatprep.mubr.msk.f32.mxu1 %vm228_vm0, %v214_v19 }
  0x24   : > { %1075 = vmatmul.mubr.msk.f32.gmra.mrb[6].mxu0 %vm228_vm0, %v199_v20 }
  0x25   : > { %1099 = vmatmul.mubr.msk.f32.gmra.mrb[6].mxu1 %vm228_vm0, %v215_v21  ;;  %1077 = vmatprep.mubr.msk.f32.mxu0 %vm228_vm0, %v200_v22 }
  0x26   : > { %1101 = vmatprep.mubr.msk.f32.mxu1 %vm228_vm0, %v216_v23 }
  0x28   : > { %1078 = vmatmul.mubr.msk.f32.gmra.mrb[8].mxu0 %vm228_vm0, %v201_v24 }
  0x29   : > { %1102 = vmatmul.mubr.msk.f32.gmra.mrb[8].mxu1 %vm228_vm0, %v217_v25  ;;  %1080 = vmatprep.mubr.msk.f32.mxu0 %vm228_vm0, %v202_v26 }
  0x2a   : > { %1104 = vmatprep.mubr.msk.f32.mxu1 %vm228_vm0, %v218_v27 }
  0x2c   : > { %1081 = vmatmul.mubr.msk.f32.gmra.mrb[10].mxu0 %vm228_vm0, %v203_v28 }
  0x2d   : > { %1105 = vmatmul.mubr.msk.f32.gmra.mrb[10].mxu1 %vm228_vm0, %v219_v29  ;;  %1083 = vmatprep.mubr.msk.f32.mxu0 %vm228_vm0, %v204_v30 }
  0x2e   : > { %1107 = vmatprep.mubr.msk.f32.mxu1 %vm228_vm0, %v220_v31 }
  0x30   : > { %1084 = vmatmul.mubr.msk.f32.gmra.mrb[12].mxu0 %vm228_vm0, %v205_v32 }
  0x31   : > { %1108 = vmatmul.mubr.msk.f32.gmra.mrb[12].mxu1 %vm228_vm0, %v221_v33  ;;  %1086 = vmatprep.mubr.msk.f32.mxu0 %vm228_vm0, %v206_v34 }
  0x32   : > { %1110 = vmatprep.mubr.msk.f32.mxu1 %vm228_vm0, %v222_v35 }
  0x34   : > { %1087 = vmatmul.mubr.msk.f32.gmra.mrb[14].mxu0 %vm228_vm0, %v207_v36 }
  0x35   : > { %1111 = vmatmul.mubr.msk.f32.gmra.mrb[14].mxu1 %vm228_vm0, %v223_v37 }
  0xeb   : > { %v1067_v39 = vpop.f32.mrb[0].mxu0 }
  0xec   : > { %v1091_v40 = vpop.f32.mrb[0].mxu1  ;;  %v558_v41 = vsub.f32 %v1067_v39, %v1440_v38  ;;  %v391_v43 = vpop.f32.mrb[1].mxu0 }
  0xed   : > { %v574_v42 = vsub.f32 %v1091_v40, %v1440_v38  ;;  %v471_v44 = vpop.f32.mrb[1].mxu1  ;;  %v557_v45 = vsub.f32 %v391_v43, %v1440_v38 }
  0xee   : > { %v573_v46 = vsub.f32 %v471_v44, %v1440_v38  ;;  %591 = vst.msk [vmem:[%s1446_s12 + $0x8] sm:$0xff] %vm589_vm1, %v558_v41 }
  0xef   : > { %607 = vst.msk [vmem:[%s1446_s12 + $0x88] sm:$0xff] %vm589_vm1, %v574_v42  ;;  %590 = vst.msk [vmem:[%s1446_s12] sm:$0xff] %vm589_vm1, %v557_v45  ;;  %v1070_v47 = vpop.f32.mrb[2].mxu0 }
  0xf0   : > { %606 = vst.msk [vmem:[%s1446_s12 + $0x80] sm:$0xff] %vm589_vm1, %v573_v46  ;;  %v1094_v48 = vpop.f32.mrb[2].mxu1  ;;  %v560_v49 = vsub.f32 %v1070_v47, %v1440_v38  ;;  %v401_v51 = vpop.f32.mrb[3].mxu0 }
  0xf1   : > { %v576_v50 = vsub.f32 %v1094_v48, %v1440_v38  ;;  %v481_v52 = vpop.f32.mrb[3].mxu1  ;;  %v559_v53 = vsub.f32 %v401_v51, %v1440_v38 }
  0xf2   : > { %v575_v54 = vsub.f32 %v481_v52, %v1440_v38  ;;  %593 = vst.msk [vmem:[%s1446_s12 + $0x18] sm:$0xff] %vm589_vm1, %v560_v49 }
  0xf3   : > { %609 = vst.msk [vmem:[%s1446_s12 + $0x98] sm:$0xff] %vm589_vm1, %v576_v50  ;;  %592 = vst.msk [vmem:[%s1446_s12 + $0x10] sm:$0xff] %vm589_vm1, %v559_v53  ;;  %v1073_v55 = vpop.f32.mrb[4].mxu0 }
  0xf4   : > { %608 = vst.msk [vmem:[%s1446_s12 + $0x90] sm:$0xff] %vm589_vm1, %v575_v54  ;;  %v1097_v56 = vpop.f32.mrb[4].mxu1  ;;  %v562_v57 = vsub.f32 %v1073_v55, %v1440_v38  ;;  %v411_v59 = vpop.f32.mrb[5].mxu0 }
  0xf5   : > { %v578_v58 = vsub.f32 %v1097_v56, %v1440_v38  ;;  %v491_v60 = vpop.f32.mrb[5].mxu1  ;;  %v561_v61 = vsub.f32 %v411_v59, %v1440_v38 }
  0xf6   : > { %v577_v62 = vsub.f32 %v491_v60, %v1440_v38  ;;  %595 = vst.msk [vmem:[%s1446_s12 + $0x28] sm:$0xff] %vm589_vm1, %v562_v57 }
  0xf7   : > { %611 = vst.msk [vmem:[%s1446_s12 + $0xa8] sm:$0xff] %vm589_vm1, %v578_v58  ;;  %594 = vst.msk [vmem:[%s1446_s12 + $0x20] sm:$0xff] %vm589_vm1, %v561_v61  ;;  %v1076_v63 = vpop.f32.mrb[6].mxu0 }
  0xf8   : > { %610 = vst.msk [vmem:[%s1446_s12 + $0xa0] sm:$0xff] %vm589_vm1, %v577_v62  ;;  %v1100_v0 = vpop.f32.mrb[6].mxu1  ;;  %v564_v1 = vsub.f32 %v1076_v63, %v1440_v38  ;;  %v421_v3 = vpop.f32.mrb[7].mxu0 }
  0xf9   : > { %v580_v2 = vsub.f32 %v1100_v0, %v1440_v38  ;;  %v501_v4 = vpop.f32.mrb[7].mxu1  ;;  %v563_v5 = vsub.f32 %v421_v3, %v1440_v38 }
  0xfa   : > { %v579_v6 = vsub.f32 %v501_v4, %v1440_v38  ;;  %597 = vst.msk [vmem:[%s1446_s12 + $0x38] sm:$0xff] %vm589_vm1, %v564_v1 }
  0xfb   : > { %613 = vst.msk [vmem:[%s1446_s12 + $0xb8] sm:$0xff] %vm589_vm1, %v580_v2  ;;  %596 = vst.msk [vmem:[%s1446_s12 + $0x30] sm:$0xff] %vm589_vm1, %v563_v5  ;;  %v1079_v7 = vpop.f32.mrb[8].mxu0 }
  0xfc   : > { %612 = vst.msk [vmem:[%s1446_s12 + $0xb0] sm:$0xff] %vm589_vm1, %v579_v6  ;;  %v1103_v8 = vpop.f32.mrb[8].mxu1  ;;  %v566_v9 = vsub.f32 %v1079_v7, %v1440_v38  ;;  %v431_v11 = vpop.f32.mrb[9].mxu0 }
  0xfd   : > { %v582_v10 = vsub.f32 %v1103_v8, %v1440_v38  ;;  %v511_v12 = vpop.f32.mrb[9].mxu1  ;;  %v565_v13 = vsub.f32 %v431_v11, %v1440_v38 }
  0xfe   : > { %v581_v14 = vsub.f32 %v511_v12, %v1440_v38  ;;  %599 = vst.msk [vmem:[%s1446_s12 + $0x48] sm:$0xff] %vm589_vm1, %v566_v9 }
  0xff   : > { %615 = vst.msk [vmem:[%s1446_s12 + $0xc8] sm:$0xff] %vm589_vm1, %v582_v10  ;;  %598 = vst.msk [vmem:[%s1446_s12 + $0x40] sm:$0xff] %vm589_vm1, %v565_v13  ;;  %v1082_v15 = vpop.f32.mrb[10].mxu0 }
 0x100   : > { %614 = vst.msk [vmem:[%s1446_s12 + $0xc0] sm:$0xff] %vm589_vm1, %v581_v14  ;;  %v1106_v16 = vpop.f32.mrb[10].mxu1  ;;  %v568_v17 = vsub.f32 %v1082_v15, %v1440_v38  ;;  %v441_v19 = vpop.f32.mrb[11].mxu0 }
 0x101   : > { %v584_v18 = vsub.f32 %v1106_v16, %v1440_v38  ;;  %v521_v20 = vpop.f32.mrb[11].mxu1  ;;  %v567_v21 = vsub.f32 %v441_v19, %v1440_v38 }
 0x102   : > { %v583_v22 = vsub.f32 %v521_v20, %v1440_v38  ;;  %601 = vst.msk [vmem:[%s1446_s12 + $0x58] sm:$0xff] %vm589_vm1, %v568_v17 }
 0x103   : > { %617 = vst.msk [vmem:[%s1446_s12 + $0xd8] sm:$0xff] %vm589_vm1, %v584_v18  ;;  %600 = vst.msk [vmem:[%s1446_s12 + $0x50] sm:$0xff] %vm589_vm1, %v567_v21  ;;  %v1085_v23 = vpop.f32.mrb[12].mxu0 }
 0x104   : > { %616 = vst.msk [vmem:[%s1446_s12 + $0xd0] sm:$0xff] %vm589_vm1, %v583_v22  ;;  %v1109_v24 = vpop.f32.mrb[12].mxu1  ;;  %v570_v25 = vsub.f32 %v1085_v23, %v1440_v38  ;;  %v451_v27 = vpop.f32.mrb[13].mxu0 }
 0x105   : > { %v586_v26 = vsub.f32 %v1109_v24, %v1440_v38  ;;  %v531_v28 = vpop.f32.mrb[13].mxu1  ;;  %v569_v29 = vsub.f32 %v451_v27, %v1440_v38 }
 0x106   : > { %v585_v30 = vsub.f32 %v531_v28, %v1440_v38  ;;  %603 = vst.msk [vmem:[%s1446_s12 + $0x68] sm:$0xff] %vm589_vm1, %v570_v25  ;;  %628 = sbr.rel (!%p1346_p4) target bundleno = 325 (0x145), region = 36 }
 0x107   : > { %619 = vst.msk [vmem:[%s1446_s12 + $0xe8] sm:$0xff] %vm589_vm1, %v586_v26  ;;  %602 = vst.msk [vmem:[%s1446_s12 + $0x60] sm:$0xff] %vm589_vm1, %v569_v29  ;;  %v1088_v31 = vpop.f32.mrb[14].mxu0 }
 0x108   : > { %618 = vst.msk [vmem:[%s1446_s12 + $0xe0] sm:$0xff] %vm589_vm1, %v585_v30  ;;  %v1112_v32 = vpop.f32.mrb[14].mxu1  ;;  %v572_v33 = vsub.f32 %v1088_v31, %v1440_v38  ;;  %v461_v35 = vpop.f32.mrb[15].mxu0 }
 0x109   : > { %v588_v34 = vsub.f32 %v1112_v32, %v1440_v38  ;;  %v541_v36 = vpop.f32.mrb[15].mxu1  ;;  %v571_v37 = vsub.f32 %v461_v35, %v1440_v38 }
 0x10a   : > { %v587_v39 = vsub.f32 %v541_v36, %v1440_v38  ;;  %605 = vst.msk [vmem:[%s1446_s12 + $0x78] sm:$0xff] %vm589_vm1, %v572_v33 }
 0x10b   : > { %621 = vst.msk [vmem:[%s1446_s12 + $0xf8] sm:$0xff] %vm589_vm1, %v588_v34  ;;  %604 = vst.msk [vmem:[%s1446_s12 + $0x70] sm:$0xff] %vm589_vm1, %v571_v37 }
 0x10c   : > { %620 = vst.msk [vmem:[%s1446_s12 + $0xf0] sm:$0xff] %vm589_vm1, %v587_v39 }
 0x10d   : > { %s1693_s14 = smov (!%p631_p8, %s630_s14), 32 }
 0x10e   : > { %s1003_s23 = sshll.u32 %s1693_s14, 7 }
 0x10f   : > { %p1006_p9 = scmp.eq.s32.totalorder %s1003_s23, 0 }
 0x110   : > { %s1553_s24 = sshrl.u32 (!%p1006_p9), %s1693_s14, 5 }
 0x111   : > { %639 = sbr.rel (%p1006_p9) target bundleno = 325 (0x145), region = 40  ;;  %p1007_p10 = scmp.le.s32.totalorder (!%p1006_p9), %s1553_s24, 0 }
 0x118   : > { %917 = sbr.rel (%p1007_p10) target bundleno = 304 (0x130), region = 116  ;;  %s1684_s15 = smov (!%p1007_p10), %s1547_s22 }
 0x119   : > { %s1685_s20 = smov (!%p1007_p10), %s1446_s12  ;;  %s1562_s25 = smov (!%p1007_p10), 0  }
 0x11a   : > { %s1564_s26 = smov (!%p1007_p10), 0  }
 0x11f LB: >> { %v763_v38 = vld [vmem:[%s1275_s20] sm:$0xff]  ;;  %v765_v40 = vld [vmem:[%s1275_s20 + $0x8] sm:$0xff]  ;;  %v767_v41 = vld [vmem:[%s1275_s20 + $0x10] sm:$0xff]  ;;  %s827_s27 = sadd.s32 1, %s1279_s25  ;;  %s757_s26 = sadd.s32 1, %s1283_s26   ;;  %s1283_s26 = sphi %s1564_s26, %s757_s26   ;;  %s1279_s25 = sphi %s1562_s25, %s1688_s25   ;;  %s1275_s20 = sphi %s1685_s20, %s1687_s20   ;;  %s1271_s15 = sphi %s1684_s15, %s1686_s15  }
 0x120   : >> { %764 = vst [vmem:[%s1271_s15] sm:$0xff] %v763_v38  ;;  %766 = vst [vmem:[%s1271_s15 + $0x8] sm:$0xff] %v765_v40  ;;  %v769_v42 = vld [vmem:[%s1275_s20 + $0x18] sm:$0xff]  ;;  %v771_v43 = vld [vmem:[%s1275_s20 + $0x20] sm:$0xff]  ;;  %p828_p11 = scmp.ge.s32.totalorder %s827_s27, %s1553_s24  ;;  %p756_p12 = scmp.ge.s32.totalorder %s757_s26, %s1553_s24 }
 0x121   : >> { %768 = vst [vmem:[%s1271_s15 + $0x10] sm:$0xff] %v767_v41  ;;  %v773_v44 = vld [vmem:[%s1275_s20 + $0x28] sm:$0xff]  ;;  %770 = vst [vmem:[%s1271_s15 + $0x18] sm:$0xff] %v769_v42  ;;  %v775_v45 = vld [vmem:[%s1275_s20 + $0x30] sm:$0xff] }
 0x122   : >> { %772 = vst [vmem:[%s1271_s15 + $0x20] sm:$0xff] %v771_v43  ;;  %774 = vst [vmem:[%s1271_s15 + $0x28] sm:$0xff] %v773_v44  ;;  %v777_v46 = vld [vmem:[%s1275_s20 + $0x38] sm:$0xff]  ;;  %v779_v47 = vld [vmem:[%s1275_s20 + $0x40] sm:$0xff]  ;;  %s1695_s27 = smov (%p828_p11, %s827_s27), 0 }
 0x123   : >> { %776 = vst [vmem:[%s1271_s15 + $0x30] sm:$0xff] %v775_v45  ;;  %778 = vst [vmem:[%s1271_s15 + $0x38] sm:$0xff] %v777_v46  ;;  %v781_v48 = vld [vmem:[%s1275_s20 + $0x48] sm:$0xff]  ;;  %v783_v49 = vld [vmem:[%s1275_s20 + $0x50] sm:$0xff]  ;;  %s1008_s28 = sshll.u32 %s1695_s27, 8  ;;  %s1688_s25 = smov %s1695_s27 }
 0x124   : >> { %780 = vst [vmem:[%s1271_s15 + $0x40] sm:$0xff] %v779_v47  ;;  %v785_v50 = vld [vmem:[%s1275_s20 + $0x58] sm:$0xff]  ;;  %782 = vst [vmem:[%s1271_s15 + $0x48] sm:$0xff] %v781_v48  ;;  %v787_v51 = vld [vmem:[%s1275_s20 + $0x60] sm:$0xff]  ;;  %s1620_s29 = scalar_lea.vmem %s1446_s12, %s1008_s28 [#allocation2]   ;;  %s833_s30 = scalar_lea.vmem %s1547_s22, %s1008_s28  }
 0x125   : >> { %784 = vst [vmem:[%s1271_s15 + $0x50] sm:$0xff] %v783_v49  ;;  %786 = vst [vmem:[%s1271_s15 + $0x58] sm:$0xff] %v785_v50  ;;  %v789_v52 = vld [vmem:[%s1275_s20 + $0x68] sm:$0xff]  ;;  %v791_v53 = vld [vmem:[%s1275_s20 + $0x70] sm:$0xff] }
 0x126   : >> { %788 = vst [vmem:[%s1271_s15 + $0x60] sm:$0xff] %v787_v51  ;;  %790 = vst [vmem:[%s1271_s15 + $0x68] sm:$0xff] %v789_v52  ;;  %v793_v54 = vld [vmem:[%s1275_s20 + $0x78] sm:$0xff]  ;;  %v795_v55 = vld [vmem:[%s1275_s20 + $0x80] sm:$0xff] }
 0x127   : >> { %792 = vst [vmem:[%s1271_s15 + $0x70] sm:$0xff] %v791_v53  ;;  %v797_v56 = vld [vmem:[%s1275_s20 + $0x88] sm:$0xff]  ;;  %794 = vst [vmem:[%s1271_s15 + $0x78] sm:$0xff] %v793_v54  ;;  %v799_v57 = vld [vmem:[%s1275_s20 + $0x90] sm:$0xff] }
 0x128   : >> { %796 = vst [vmem:[%s1271_s15 + $0x80] sm:$0xff] %v795_v55  ;;  %798 = vst [vmem:[%s1271_s15 + $0x88] sm:$0xff] %v797_v56  ;;  %v801_v58 = vld [vmem:[%s1275_s20 + $0x98] sm:$0xff]  ;;  %v803_v59 = vld [vmem:[%s1275_s20 + $0xa0] sm:$0xff] }
 0x129   : >> { %800 = vst [vmem:[%s1271_s15 + $0x90] sm:$0xff] %v799_v57  ;;  %802 = vst [vmem:[%s1271_s15 + $0x98] sm:$0xff] %v801_v58  ;;  %v805_v60 = vld [vmem:[%s1275_s20 + $0xa8] sm:$0xff]  ;;  %v807_v61 = vld [vmem:[%s1275_s20 + $0xb0] sm:$0xff]  ;;  %759 = sbr.rel (!%p756_p12) target bundleno = 287 (0x11f), region = 122 }
 0x12a   : >> { %804 = vst [vmem:[%s1271_s15 + $0xa0] sm:$0xff] %v803_v59  ;;  %v809_v62 = vld [vmem:[%s1275_s20 + $0xb8] sm:$0xff]  ;;  %806 = vst [vmem:[%s1271_s15 + $0xa8] sm:$0xff] %v805_v60  ;;  %v811_v63 = vld [vmem:[%s1275_s20 + $0xc0] sm:$0xff] }
 0x12b   : >> { %808 = vst [vmem:[%s1271_s15 + $0xb0] sm:$0xff] %v807_v61  ;;  %810 = vst [vmem:[%s1271_s15 + $0xb8] sm:$0xff] %v809_v62  ;;  %v813_v0 = vld [vmem:[%s1275_s20 + $0xc8] sm:$0xff]  ;;  %v815_v1 = vld [vmem:[%s1275_s20 + $0xd0] sm:$0xff] }
 0x12c   : >> { %812 = vst [vmem:[%s1271_s15 + $0xc0] sm:$0xff] %v811_v63  ;;  %814 = vst [vmem:[%s1271_s15 + $0xc8] sm:$0xff] %v813_v0  ;;  %v817_v2 = vld [vmem:[%s1275_s20 + $0xd8] sm:$0xff]  ;;  %v819_v3 = vld [vmem:[%s1275_s20 + $0xe0] sm:$0xff] }
 0x12d   : >> { %816 = vst [vmem:[%s1271_s15 + $0xd0] sm:$0xff] %v815_v1  ;;  %v821_v4 = vld [vmem:[%s1275_s20 + $0xe8] sm:$0xff]  ;;  %818 = vst [vmem:[%s1271_s15 + $0xd8] sm:$0xff] %v817_v2  ;;  %v823_v5 = vld [vmem:[%s1275_s20 + $0xf0] sm:$0xff] }
 0x12e   : >> { %820 = vst [vmem:[%s1271_s15 + $0xe0] sm:$0xff] %v819_v3  ;;  %822 = vst [vmem:[%s1271_s15 + $0xe8] sm:$0xff] %v821_v4  ;;  %v825_v6 = vld [vmem:[%s1275_s20 + $0xf8] sm:$0xff]  ;;  %s1687_s20 = smov %s1620_s29 }
 0x12f   : >> { %824 = vst [vmem:[%s1271_s15 + $0xf0] sm:$0xff] %v823_v5  ;;  %826 = vst [vmem:[%s1271_s15 + $0xf8] sm:$0xff] %v825_v6  ;;  %s1686_s15 = smov %s833_s30 }
 0x130 PF: > { %s1661_s4 = sand.u32 31, %s1693_s14   ;;  %s1019_s5 = sshll.u32 %s1553_s24, 8 }
 0x131   : > { %s838_s6 = scalar_lea.vmem %s1446_s12, %s1019_s5 [#allocation2]   ;;  %s840_s7 = scalar_lea.vmem %s1547_s22, %s1019_s5  }
 0x132   : > { %p1013_p13 = scmp.le.s32.totalorder %s1661_s4, 0 }
 0x133   : > { %s1285_s8 = smov (!%p1013_p13), %s840_s7   ;;  %s1289_s9 = smov (!%p1013_p13), %s838_s6  }
 0x134   : > { %931 = sbr.rel (%p1013_p13) target bundleno = 325 (0x145), region = 127  ;;  %s1293_s10 = smov (!%p1013_p13), 0  }
 0x135   : > { %s1297_s11 = smov (!%p1013_p13), 0  }
 0x13b LB: >> { %v850_v7 = vld [vmem:[%s1291_s9] sm:$0xff]  ;;  %s852_s14 = sadd.s32 1, %s1295_s10  ;;  %s844_s11 = sadd.s32 1, %s1299_s11   ;;  %s1299_s11 = sphi %s1297_s11, %s844_s11   ;;  %s1295_s10 = sphi %s1293_s10, %s1294_s10   ;;  %s1291_s9 = sphi %s1289_s9, %s857_s9   ;;  %s1287_s8 = sphi %s1285_s8, %s858_s8  }
 0x13c   : >> { %851 = vst [vmem:[%s1287_s8] sm:$0xff] %v850_v7  ;;  %p853_p0 = scmp.ge.s32.totalorder %s852_s14, %s1661_s4  ;;  %p843_p1 = scmp.ge.s32.totalorder %s844_s11, %s1661_s4 }
 0x13e   : >> { %s1697_s14 = smov (%p853_p0, %s852_s14), 0  ;;  %846 = sbr.rel (!%p843_p1) target bundleno = 315 (0x13b), region = 133 }
 0x13f   : >> { %s1014_s12 = sshll.u32 %s1697_s14, 3  ;;  %s1294_s10 = smov %s1697_s14  }
 0x140   : >> { %s857_s9 = scalar_lea.vmem %s838_s6, %s1014_s12 [#allocation2]   ;;  %s858_s8 = scalar_lea.vmem %s840_s7, %s1014_s12  }
 0x145 PF: > { %p10_p2 = scmp.ge.s32.totalorder %s1336_s16, 6   ;;  %s1689_s12 = smov %s1263_s13 }
 0x146   : > { %s1690_s13 = smov %s1344_s19  ;;  %s1691_s14 = smov %s1336_s16 }
 0x147   :  { %12 = sbr.rel (!%p10_p2) target bundleno = 2 (0x2), region = 144 }

</bundles_post_ra>
